<compile_context>
chip_gen: v5e
topology: v5e:2x2
jax: 0.10.0
libtpu: 0.0.40
codegen_flags: <defaults>
</compile_context>

<pallas_src>
import jax
import jax.numpy as jnp
from jax.experimental import pallas as pl
from jax.experimental.pallas import tpu as pltpu


def _sclstm_seq_kernel(
    x_ref,      # (1, bt, I)     input for current timestep / batch block
    s_ref,      # (1, bt, S)     slot vector for current timestep / batch block
    h0_ref,     # (bt, H)        initial hidden state
    c0_ref,     # (bt, H)        initial cell state
    wg_ref,     # (I+H, 4H)      gate weights (VMEM-resident across steps)
    bg_ref,     # (1, 4H)        gate bias
    ws_ref,     # (S, H)         slot linear weights
    bs_ref,     # (1, H)         slot linear bias
    hc_ref,     # (1, 2, bt, H)  output: [h_t, c_t] for this step
    h_scr,      # (bt, H) f32    carried hidden state
    c_scr,      # (bt, H) f32    carried cell state
):
    H = h_scr.shape[1]
    I = x_ref.shape[2]
    t = pl.program_id(1)

    # First timestep of each batch block: load the initial state into scratch.
    @pl.when(t == 0)
    def _init():
        h_scr[...] = h0_ref[...].astype(jnp.float32)
        c_scr[...] = c0_ref[...].astype(jnp.float32)

    cdt = wg_ref.dtype                      # bf16 weights -> bf16 MXU inputs
    x = x_ref[0].astype(cdt)                # (bt, I)
    h = h_scr[...].astype(cdt)              # (bt, H)

    if I % 128 == 0:
        # Lane-aligned: single merged [x, h] @ W matmul (one MXU pass).
        xh = jnp.concatenate([x, h], axis=-1)
        gates = jnp.dot(xh, wg_ref[...], preferred_element_type=jnp.float32)
    else:
        # Unaligned toy sizes: two dots against row-slices of the same
        # resident weight (sublane slicing is cheap; avoids a lane relayout).
        gates = (
            jnp.dot(x, wg_ref[:I, :], preferred_element_type=jnp.float32)
            + jnp.dot(h, wg_ref[I:, :], preferred_element_type=jnp.float32)
        )
    gates = gates + bg_ref[...]             # (bt, 4H) f32

    # Full-width nonlinearities on the whole gates tile, then lane-slice.
    lane = jax.lax.broadcasted_iota(jnp.int32, gates.shape, 1)
    act = jnp.where(lane < 3 * H, jax.nn.sigmoid(gates), jnp.tanh(gates))
    i_gate = act[:, 0 * H:1 * H]
    f_gate = act[:, 1 * H:2 * H]
    o_gate = act[:, 2 * H:3 * H]
    info = act[:, 3 * H:4 * H]

    slot_info = jnp.tanh(
        jnp.dot(s_ref[0].astype(ws_ref.dtype), ws_ref[...],
                preferred_element_type=jnp.float32)
        + bs_ref[...]
    )

    next_c = f_gate * c_scr[...] + i_gate * info + slot_info
    next_h = o_gate * jnp.tanh(next_c)

    # Carry state, emit this step's (h, c) as one contiguous slab.
    h_scr[...] = next_h
    c_scr[...] = next_c
    hc_ref[0, 0] = next_h.astype(hc_ref.dtype)
    hc_ref[0, 1] = next_c.astype(hc_ref.dtype)


def prepare_params(params):
    """One-time preprocessing of PyTorch-layout weights (hoisted out of the
    per-call path): transpose (out,in) -> (in,out) and reshape biases."""
    H4 = params["gates_w"].shape[0]
    H = H4 // 4
    return {
        "w_gates": jnp.asarray(params["gates_w"]).T,           # (I+H, 4H)
        "b_gates": jnp.asarray(params["gates_b"]).reshape(1, H4),
        "w_slot": jnp.asarray(params["slot_w"]).T,             # (S, H)
        "b_slot": jnp.asarray(params["slot_b"]).reshape(1, H),
    }


def sclstm_sequence(xs, h0, c0, slots, prep, *, batch_block=None):
    """Fused SCLSTM over a whole sequence in a single pallas_call.

    xs:    (T, B, input_size)
    h0,c0: (B, hidden_size)
    slots: (T, B, slot_size)
    prep:  output of prepare_params()
    returns (hs, cs), each (T, B, hidden_size)
    """
    T, B, I = xs.shape
    H = h0.shape[1]
    S = slots.shape[2]

    if batch_block is None:
        batch_block = B          # demo-sized batches: one block (single core)
    assert B % batch_block == 0
    bt = batch_block
    nb = B // bt

    out = pl.pallas_call(
        _sclstm_seq_kernel,
        out_shape=jax.ShapeDtypeStruct((T, 2, B, H), h0.dtype),
        grid=(nb, T),
        in_specs=[
            pl.BlockSpec((1, bt, I), lambda b, t: (t, b, 0)),
            pl.BlockSpec((1, bt, S), lambda b, t: (t, b, 0)),
            pl.BlockSpec((bt, H), lambda b, t: (b, 0)),
            pl.BlockSpec((bt, H), lambda b, t: (b, 0)),
            # Weights / biases: constant index_map -> VMEM-resident across T.
            pl.BlockSpec((I + H, 4 * H), lambda b, t: (0, 0)),
            pl.BlockSpec((1, 4 * H), lambda b, t: (0, 0)),
            pl.BlockSpec((S, H), lambda b, t: (0, 0)),
            pl.BlockSpec((1, H), lambda b, t: (0, 0)),
        ],
        out_specs=pl.BlockSpec((1, 2, bt, H), lambda b, t: (t, 0, b, 0)),
        scratch_shapes=[
            pltpu.VMEM((bt, H), jnp.float32),   # carried h
            pltpu.VMEM((bt, H), jnp.float32),   # carried c
        ],
        compiler_params=pltpu.CompilerParams(
            dimension_semantics=("parallel", "arbitrary"),
            vmem_limit_bytes=32 * 1024 * 1024,
        ),
    )(xs, slots, h0, c0,
      prep["w_gates"], prep["b_gates"], prep["w_slot"], prep["b_slot"])

    hs = out[:, 0]
    cs = out[:, 1]
    return hs, cs


def sclstm_cell(inputs, h, c, slot_state, prep):
    """Original-module semantics (one timestep) as T=1 of the fused kernel."""
    hs, cs = sclstm_sequence(inputs[None], h, c, slot_state[None], prep)
    return hs[0], cs[0]


# ------------------------- plain-JAX references -------------------------

def sclstm_cell_ref(inputs, h, c, slot_state, params):
    H = h.shape[1]
    combined = jnp.concatenate([inputs, h], axis=1)
    all_gates = combined @ params["gates_w"].T + params["gates_b"]
    i_gate = jax.nn.sigmoid(all_gates[:, 0 * H:1 * H])
    f_gate = jax.nn.sigmoid(all_gates[:, 1 * H:2 * H])
    o_gate = jax.nn.sigmoid(all_gates[:, 2 * H:3 * H])
    info = jnp.tanh(all_gates[:, 3 * H:4 * H])
    slot_info = jnp.tanh(slot_state @ params["slot_w"].T + params["slot_b"])
    next_c = f_gate * c + i_gate * info + slot_info
    next_h = o_gate * jnp.tanh(next_c)
    return next_h, next_c


def sclstm_sequence_ref(xs, h0, c0, slots, params):
    h, c = h0, c0
    hs, cs = [], []
    for t in range(xs.shape[0]):
        h, c = sclstm_cell_ref(xs[t], h, c, slots[t], params)
        hs.append(h)
        cs.append(c)
    return jnp.stack(hs), jnp.stack(cs)


def init_params(key, input_size, hidden_size, slot_size, dtype=jnp.float32):
    """nn.Linear-style uniform(+-1/sqrt(fan_in)) init."""
    k1, k2, k3, k4 = jax.random.split(key, 4)
    fan_g = input_size + hidden_size
    fan_s = slot_size
    bound_g = 1.0 / jnp.sqrt(jnp.float32(fan_g))
    bound_s = 1.0 / jnp.sqrt(jnp.float32(fan_s))
    return {
        "gates_w": jax.random.uniform(
            k1, (4 * hidden_size, fan_g), dtype, -bound_g, bound_g),
        "gates_b": jax.random.uniform(
            k2, (4 * hidden_size,), dtype, -bound_g, bound_g),
        "slot_w": jax.random.uniform(
            k3, (hidden_size, slot_size), dtype, -bound_s, bound_s),
        "slot_b": jax.random.uniform(
            k4, (hidden_size,), dtype, -bound_s, bound_s),
    }


if __name__ == "__main__":
    B, INPUT, HIDDEN, SLOT, T = 8, 32, 32, 16, 6
    key = jax.random.PRNGKey(0)
    k_x, k_h, k_c, k_s, k_p = jax.random.split(key, 5)

    xs = jax.random.normal(k_x, (T, B, INPUT), jnp.float32)
    h0 = jax.random.normal(k_h, (B, HIDDEN), jnp.float32)
    c0 = jax.random.normal(k_c, (B, HIDDEN), jnp.float32)
    slots = jax.random.normal(k_s, (T, B, SLOT), jnp.float32)
    params = init_params(k_p, INPUT, HIDDEN, SLOT)
    prep = prepare_params(params)   # one-time weight transposes (hoisted)

    seq_fn = jax.jit(sclstm_sequence)
    cell_fn = jax.jit(sclstm_cell)

    # Fused sequence (the fast path).
    hs, cs = jax.block_until_ready(seq_fn(xs, h0, c0, slots, prep))
    hs_ref, cs_ref = sclstm_sequence_ref(xs, h0, c0, slots, params)
    assert jnp.allclose(hs, hs_ref, atol=1e-3, rtol=1e-3), "sequence h mismatch"
    assert jnp.allclose(cs, cs_ref, atol=1e-3, rtol=1e-3), "sequence c mismatch"

    # Single-cell semantics of the original PyTorch module (T = 1).
    nh, nc = jax.block_until_ready(cell_fn(xs[0], h0, c0, slots[0], prep))
    rh, rc = sclstm_cell_ref(xs[0], h0, c0, slots[0], params)
    assert jnp.allclose(nh, rh, atol=1e-4, rtol=1e-4), "cell h mismatch"
    assert jnp.allclose(nc, rc, atol=1e-4, rtol=1e-4), "cell c mismatch"

    print("KERNEL_OK")
</pallas_src>

<mosaic_0001>
module attributes {stable_mosaic.version = 11 : i64} {
  func.func @_sclstm_seq_kernel(%arg0: i32, %arg1: i32, %arg2: memref<1x8x32xf32, #tpu.memory_space<vmem>>, %arg3: memref<1x8x16xf32, #tpu.memory_space<vmem>>, %arg4: memref<8x32xf32, #tpu.memory_space<vmem>>, %arg5: memref<8x32xf32, #tpu.memory_space<vmem>>, %arg6: memref<64x128xf32, #tpu.memory_space<vmem>>, %arg7: memref<1x128xf32, #tpu.memory_space<vmem>>, %arg8: memref<16x32xf32, #tpu.memory_space<vmem>>, %arg9: memref<1x32xf32, #tpu.memory_space<vmem>>, %arg10: memref<1x2x8x32xf32, #tpu.memory_space<vmem>>, %arg11: memref<8x32xf32, #tpu.memory_space<vmem>>, %arg12: memref<8x32xf32, #tpu.memory_space<vmem>>) attributes {dimension_semantics = [#tpu.dimension_semantics<parallel>, #tpu.dimension_semantics<arbitrary>], iteration_bounds = array<i64: 1, 6>, scalar_prefetch = 0 : i64, scratch_operands = 2 : i64, tpu.core_type = #tpu.core_type<tc>, window_params = [{transform_indices = @transform_0, window_bounds = array<i64: 1, 8, 32>}, {transform_indices = @transform_1, window_bounds = array<i64: 1, 8, 16>}, {transform_indices = @transform_2, window_bounds = array<i64: 8, 32>}, {transform_indices = @transform_3, window_bounds = array<i64: 8, 32>}, {pipeline_mode = #tpu.pipeline_mode<synchronous>, transform_indices = @transform_4, window_bounds = array<i64: 64, 128>}, {pipeline_mode = #tpu.pipeline_mode<synchronous>, transform_indices = @transform_5, window_bounds = array<i64: 1, 128>}, {pipeline_mode = #tpu.pipeline_mode<synchronous>, transform_indices = @transform_6, window_bounds = array<i64: 16, 32>}, {pipeline_mode = #tpu.pipeline_mode<synchronous>, transform_indices = @transform_7, window_bounds = array<i64: 1, 32>}, {transform_indices = @transform_8, window_bounds = array<i64: 1, 2, 8, 32>}]} {
    %c0_i32 = arith.constant 0 : i32
    %0 = arith.cmpi eq, %arg1, %c0_i32 : i32
    %1 = arith.extui %0 : i1 to i32
    %c0_i32_0 = arith.constant 0 : i32
    %2 = arith.cmpi ne, %1, %c0_i32_0 : i32
    scf.if %2 {
      %c0_33 = arith.constant 0 : index
      %c0_34 = arith.constant 0 : index
      %51 = vector.load %arg4[%c0_33, %c0_34] : memref<8x32xf32, #tpu.memory_space<vmem>>, vector<8x32xf32>
      %c0_35 = arith.constant 0 : index
      %c0_36 = arith.constant 0 : index
      %52 = vector.load %arg11[%c0_35, %c0_36] : memref<8x32xf32, #tpu.memory_space<vmem>>, vector<8x32xf32>
      tpu.vector_store %arg11[%c0_35, %c0_36], %51 {strides = array<i32>} : memref<8x32xf32, #tpu.memory_space<vmem>>, vector<8x32xf32>,
      %c0_37 = arith.constant 0 : index
      %c0_38 = arith.constant 0 : index
      %53 = vector.load %arg5[%c0_37, %c0_38] : memref<8x32xf32, #tpu.memory_space<vmem>>, vector<8x32xf32>
      %c0_39 = arith.constant 0 : index
      %c0_40 = arith.constant 0 : index
      %54 = vector.load %arg12[%c0_39, %c0_40] : memref<8x32xf32, #tpu.memory_space<vmem>>, vector<8x32xf32>
      tpu.vector_store %arg12[%c0_39, %c0_40], %53 {strides = array<i32>} : memref<8x32xf32, #tpu.memory_space<vmem>>, vector<8x32xf32>,
    } else {
    }
    %c0 = arith.constant 0 : index
    %c0_1 = arith.constant 0 : index
    %c0_2 = arith.constant 0 : index
    %3 = vector.load %arg2[%c0, %c0_1, %c0_2] : memref<1x8x32xf32, #tpu.memory_space<vmem>>, vector<1x8x32xf32>
    %4 = vector.shape_cast %3 : vector<1x8x32xf32> to vector<8x32xf32>
    %c0_3 = arith.constant 0 : index
    %c0_4 = arith.constant 0 : index
    %5 = vector.load %arg11[%c0_3, %c0_4] : memref<8x32xf32, #tpu.memory_space<vmem>>, vector<8x32xf32>
    %c0_5 = arith.constant 0 : index
    %c0_6 = arith.constant 0 : index
    %6 = vector.load %arg6[%c0_5, %c0_6] : memref<64x128xf32, #tpu.memory_space<vmem>>, vector<32x128xf32>
    %cst = arith.constant dense<0.000000e+00> : vector<8x128xf32>
    %7 = tpu.matmul %4, %6, %cst {dimension_numbers = #tpu.dot_dimension_numbers<[1], [0], [0], [1], [0, 0, 1, 1], [], []>} : vector<8x32xf32>, vector<32x128xf32>, vector<8x128xf32> -> vector<8x128xf32>
    %c32 = arith.constant 32 : index
    %c0_7 = arith.constant 0 : index
    %8 = vector.load %arg6[%c32, %c0_7] : memref<64x128xf32, #tpu.memory_space<vmem>>, vector<32x128xf32>
    %cst_8 = arith.constant dense<0.000000e+00> : vector<8x128xf32>
    %9 = tpu.matmul %5, %8, %cst_8 {dimension_numbers = #tpu.dot_dimension_numbers<[1], [0], [0], [1], [0, 0, 1, 1], [], []>} : vector<8x32xf32>, vector<32x128xf32>, vector<8x128xf32> -> vector<8x128xf32>
    %10 = arith.addf %7, %9 : vector<8x128xf32>
    %c0_9 = arith.constant 0 : index
    %c0_10 = arith.constant 0 : index
    %11 = vector.load %arg7[%c0_9, %c0_10] : memref<1x128xf32, #tpu.memory_space<vmem>>, vector<1x128xf32>
    %12 = vector.broadcast %11 : vector<1x128xf32> to vector<8x128xf32>
    %13 = arith.addf %10, %12 : vector<8x128xf32>
    %14 = tpu.iota {dimensions = array<i32: 1>} : vector<8x128xi32>
    %c96_i32 = arith.constant 96 : i32
    %15 = vector.broadcast %c96_i32 : i32 to vector<8x128xi32>
    %16 = arith.cmpi slt, %14, %15 : vector<8x128xi32>
    %17 = arith.negf %13 : vector<8x128xf32>
    %18 = math.exp %17 : vector<8x128xf32>
    %cst_11 = arith.constant 1.000000e+00 : f32
    %19 = vector.broadcast %cst_11 : f32 to vector<8x128xf32>
    %20 = arith.addf %19, %18 : vector<8x128xf32>
    %21 = arith.divf %19, %20 : vector<8x128xf32>
    %22 = math.tanh %13 : vector<8x128xf32>
    %23 = arith.select %16, %21, %22 : vector<8x128xi1>, vector<8x128xf32>
    %24 = vector.extract_strided_slice %23 {offsets = [0, 0], sizes = [8, 32], strides = [1, 1]} : vector<8x128xf32> to vector<8x32xf32>
    %25 = vector.extract_strided_slice %23 {offsets = [0, 32], sizes = [8, 32], strides = [1, 1]} : vector<8x128xf32> to vector<8x32xf32>
    %26 = vector.extract_strided_slice %23 {offsets = [0, 64], sizes = [8, 32], strides = [1, 1]} : vector<8x128xf32> to vector<8x32xf32>
    %27 = vector.extract_strided_slice %23 {offsets = [0, 96], sizes = [8, 32], strides = [1, 1]} : vector<8x128xf32> to vector<8x32xf32>
    %c0_12 = arith.constant 0 : index
    %c0_13 = arith.constant 0 : index
    %c0_14 = arith.constant 0 : index
    %28 = vector.load %arg3[%c0_12, %c0_13, %c0_14] : memref<1x8x16xf32, #tpu.memory_space<vmem>>, vector<1x8x16xf32>
    %29 = vector.shape_cast %28 : vector<1x8x16xf32> to vector<8x16xf32>
    %c0_15 = arith.constant 0 : index
    %c0_16 = arith.constant 0 : index
    %30 = vector.load %arg8[%c0_15, %c0_16] : memref<16x32xf32, #tpu.memory_space<vmem>>, vector<16x32xf32>
    %cst_17 = arith.constant dense<0.000000e+00> : vector<8x32xf32>
    %31 = tpu.matmul %29, %30, %cst_17 {dimension_numbers = #tpu.dot_dimension_numbers<[1], [0], [0], [1], [0, 0, 1, 1], [], []>} : vector<8x16xf32>, vector<16x32xf32>, vector<8x32xf32> -> vector<8x32xf32>
    %c0_18 = arith.constant 0 : index
    %c0_19 = arith.constant 0 : index
    %32 = vector.load %arg9[%c0_18, %c0_19] : memref<1x32xf32, #tpu.memory_space<vmem>>, vector<1x32xf32>
    %33 = vector.broadcast %32 : vector<1x32xf32> to vector<8x32xf32>
    %34 = arith.addf %31, %33 : vector<8x32xf32>
    %35 = math.tanh %34 : vector<8x32xf32>
    %c0_20 = arith.constant 0 : index
    %c0_21 = arith.constant 0 : index
    %36 = vector.load %arg12[%c0_20, %c0_21] : memref<8x32xf32, #tpu.memory_space<vmem>>, vector<8x32xf32>
    %37 = arith.mulf %25, %36 : vector<8x32xf32>
    %38 = arith.mulf %24, %27 : vector<8x32xf32>
    %39 = arith.addf %37, %38 : vector<8x32xf32>
    %40 = arith.addf %39, %35 : vector<8x32xf32>
    %41 = math.tanh %40 : vector<8x32xf32>
    %42 = arith.mulf %26, %41 : vector<8x32xf32>
    %c0_22 = arith.constant 0 : index
    %c0_23 = arith.constant 0 : index
    %43 = vector.load %arg11[%c0_22, %c0_23] : memref<8x32xf32, #tpu.memory_space<vmem>>, vector<8x32xf32>
    tpu.vector_store %arg11[%c0_22, %c0_23], %42 {strides = array<i32>} : memref<8x32xf32, #tpu.memory_space<vmem>>, vector<8x32xf32>,
    %c0_24 = arith.constant 0 : index
    %c0_25 = arith.constant 0 : index
    %44 = vector.load %arg12[%c0_24, %c0_25] : memref<8x32xf32, #tpu.memory_space<vmem>>, vector<8x32xf32>
    tpu.vector_store %arg12[%c0_24, %c0_25], %40 {strides = array<i32>} : memref<8x32xf32, #tpu.memory_space<vmem>>, vector<8x32xf32>,
    %c0_26 = arith.constant 0 : index
    %c0_27 = arith.constant 0 : index
    %c0_28 = arith.constant 0 : index
    %c0_29 = arith.constant 0 : index
    %45 = vector.load %arg10[%c0_26, %c0_27, %c0_28, %c0_29] : memref<1x2x8x32xf32, #tpu.memory_space<vmem>>, vector<1x1x8x32xf32>
    %46 = vector.shape_cast %45 : vector<1x1x8x32xf32> to vector<8x32xf32>
    %47 = vector.shape_cast %42 : vector<8x32xf32> to vector<1x1x8x32xf32>
    tpu.vector_store %arg10[%c0_26, %c0_27, %c0_28, %c0_29], %47 {strides = array<i32>} : memref<1x2x8x32xf32, #tpu.memory_space<vmem>>, vector<1x1x8x32xf32>,
    %c0_30 = arith.constant 0 : index
    %c1 = arith.constant 1 : index
    %c0_31 = arith.constant 0 : index
    %c0_32 = arith.constant 0 : index
    %48 = vector.load %arg10[%c0_30, %c1, %c0_31, %c0_32] : memref<1x2x8x32xf32, #tpu.memory_space<vmem>>, vector<1x1x8x32xf32>
    %49 = vector.shape_cast %48 : vector<1x1x8x32xf32> to vector<8x32xf32>
    %50 = vector.shape_cast %40 : vector<8x32xf32> to vector<1x1x8x32xf32>
    tpu.vector_store %arg10[%c0_30, %c1, %c0_31, %c0_32], %50 {strides = array<i32>} : memref<1x2x8x32xf32, #tpu.memory_space<vmem>>, vector<1x1x8x32xf32>,
    return
  }
  func.func @transform_0(%arg0: i32, %arg1: i32) -> (i32, i32, i32) {
    %c0_i32 = arith.constant 0 : i32
    %c0_i32_0 = arith.constant 0 : i32
    return %arg1, %arg0, %c0_i32 : i32, i32, i32
  }
  func.func @transform_1(%arg0: i32, %arg1: i32) -> (i32, i32, i32) {
    %c0_i32 = arith.constant 0 : i32
    %c0_i32_0 = arith.constant 0 : i32
    return %arg1, %arg0, %c0_i32 : i32, i32, i32
  }
  func.func @transform_2(%arg0: i32, %arg1: i32) -> (i32, i32) {
    %c0_i32 = arith.constant 0 : i32
    %c0_i32_0 = arith.constant 0 : i32
    return %arg0, %c0_i32 : i32, i32
  }
  func.func @transform_3(%arg0: i32, %arg1: i32) -> (i32, i32) {
    %c0_i32 = arith.constant 0 : i32
    %c0_i32_0 = arith.constant 0 : i32
    return %arg0, %c0_i32 : i32, i32
  }
  func.func @transform_4(%arg0: i32, %arg1: i32) -> (i32, i32) {
    %c0_i32 = arith.constant 0 : i32
    %c0_i32_0 = arith.constant 0 : i32
    %c0_i32_1 = arith.constant 0 : i32
    return %c0_i32, %c0_i32_0 : i32, i32
  }
  func.func @transform_5(%arg0: i32, %arg1: i32) -> (i32, i32) {
    %c0_i32 = arith.constant 0 : i32
    %c0_i32_0 = arith.constant 0 : i32
    %c0_i32_1 = arith.constant 0 : i32
    return %c0_i32, %c0_i32_0 : i32, i32
  }
  func.func @transform_6(%arg0: i32, %arg1: i32) -> (i32, i32) {
    %c0_i32 = arith.constant 0 : i32
    %c0_i32_0 = arith.constant 0 : i32
    %c0_i32_1 = arith.constant 0 : i32
    return %c0_i32, %c0_i32_0 : i32, i32
  }
  func.func @transform_7(%arg0: i32, %arg1: i32) -> (i32, i32) {
    %c0_i32 = arith.constant 0 : i32
    %c0_i32_0 = arith.constant 0 : i32
    %c0_i32_1 = arith.constant 0 : i32
    return %c0_i32, %c0_i32_0 : i32, i32
  }
  func.func @transform_8(%arg0: i32, %arg1: i32) -> (i32, i32, i32, i32) {
    %c0_i32 = arith.constant 0 : i32
    %c0_i32_0 = arith.constant 0 : i32
    %c0_i32_1 = arith.constant 0 : i32
    return %arg1, %c0_i32, %arg0, %c0_i32_0 : i32, i32, i32, i32
  }
}

</mosaic_0001>

<bundles_post_ra>
// kernel: sclstm_sequence.1
= control target key start
LH: loop header
LB: loop body
LE: loop exit
PB: predicated region body
PF: predicated region fallthrough
CT: control target
= control target key end

     0   :  { %s1419_s0 = inlined_call_operand.hbm [shape: f32[6,8,32], index: 0, kind: input, shape index: {}]   ;;  %s1420_s1 = inlined_call_operand.hbm [shape: f32[6,8,16], index: 1, kind: input, shape index: {}]   ;;  %s1421_s2 = inlined_call_operand.hbm [shape: f32[8,32], index: 2, kind: input, shape index: {}]   ;;  %s1422_s3 = inlined_call_operand.hbm [shape: f32[8,32], index: 3, kind: input, shape index: {}]   ;;  %s1423_s4 = inlined_call_operand.hbm [shape: f32[64,128], index: 4, kind: input, shape index: {}]   ;;  %s1424_s5 = inlined_call_operand.vmem [shape: f32[1,128], index: 5, kind: input, shape index: {}]   ;;  %s1425_s6 = inlined_call_operand.hbm [shape: f32[16,32], index: 6, kind: input, shape index: {}]   ;;  %s1426_s7 = inlined_call_operand.vmem [shape: f32[1,32], index: 7, kind: input, shape index: {}]   ;;  %s1427_s8 = inlined_call_operand.vmem [shape: f32[6,2,8,32], index: 8, kind: output, shape index: {}]  }
   0x1   :  { %1431 = sst [smem:[#allocation21_spill]] %s1421_s2 }
   0x2   :  { %1432 = sst [smem:[#allocation22_spill]] %s1422_s3 }
   0x3   :  { %1433 = sst [smem:[#allocation23_spill]] %s1423_s4 }
   0x4   :  { %1434 = sst [smem:[#allocation24_spill]] %s1425_s6 }
   0x5   :  { %13 = vsyncpa [#allocation5], 0 }
   0x6   :  { %15 = vsyncpa [#allocation5 + $0x1], 0 }
   0x7   :  { %16 = vsyncpa [#allocation7], 0 }
   0x8   :  { %18 = vsyncpa [#allocation7 + $0x1], 0 }
   0x9   :  { %19 = vsyncpa [#allocation10], 0 }
   0xa   :  { %20 = vsyncpa [#allocation13], 0  ;;  %s1239_s27 = smov 0   ;;  %s1241_s28 = smov 0  }
   0xb   :  { %s1243_s29 = smov 0   ;;  %s1245_s30 = smov 0  }
   0xc   :  { %s1247_s9 = smov 0   ;;  %s1249_s10 = smov 0  }
   0xd LB: > { %1435 = sst [smem:[#allocation19_spill]] %s1179_s9  ;;  %s1428_s11 = sadd.s32 4294967295, %s1183_s10   ;;  %s1183_s10 = sphi %s1249_s10, %s26_s10   ;;  %s1179_s9 = sphi %s1247_s9, %s1449_s9   ;;  %s1175_s30 = sphi %s1245_s30, %s1448_s30   ;;  %s1171_s29 = sphi %s1243_s29, %s1452_s29   ;;  %s1167_s28 = sphi %s1241_s28, %s1451_s28   ;;  %s1163_s27 = sphi %s1239_s27, %s1450_s27  }
   0xe   : > { %p791_p0 = scmp.ge.s32.totalorder %s1183_s10, 1  ;;  %p1273_p1 = scmp.eq.s32.totalorder %s1428_s11, 0 }
   0xf   : > { %p263_p2 = scmp.lt.s32.totalorder %s1183_s10, 7  ;;  %s1437_s2 = sld [smem:[#allocation21_spill]] }
  0x10   : > { %s1185_s17 = smov [#allocation8]   ;;  %s1439_s3 = sld [smem:[#allocation22_spill]] }
  0x11   : > { %p1281_p3 = pnand %p791_p0, %p263_p2  ;;  %s279_s18 = sshll.u32 %s1185_s17, 4  ;;  %s280_s18 = int_to_ptr.vmem [resolvable:$true] %s279_s18 }
  0x12   : > { %s1441_s4 = sld [smem:[#allocation23_spill]]  ;;  %s1186_s26 = smov [#allocation9]  }
  0x13   : > { %p839_p4 = pneg %p1281_p3  ;;  %s293_s13 = sshll.u32 %s1186_s26, 4  ;;  %s294_s13 = int_to_ptr.vmem [resolvable:$true] %s293_s13 }
  0x14   : > { %s1187_s14 = smov [#allocation11]   ;;  %s1442_s6 = sld [smem:[#allocation24_spill]] }
  0x15   : > { %s277_s15 = sshll.u32 %s1437_s2, 4  ;;  %p1292_p5 = pnand %p839_p4, %p1273_p1  ;;  %s278_s15 = int_to_ptr.hbm [resolvable:$true] %s277_s15 }
  0x16   : > { %s291_s21 = sshll.u32 %s1439_s3, 4  ;;  %s304_s17 = sshll.u32 %s1187_s14, 4  ;;  %s292_s21 = int_to_ptr.hbm [resolvable:$true] %s291_s21  ;;  %s305_s17 = int_to_ptr.vmem [resolvable:$true] %s304_s17 }
  0x17   : > { %842 = dma.hbm_to_vmem [thread:$0]  (!%p1292_p5), %s278_s15, 128, %s280_s18, [#allocation7]  }
  0x18   : > { %s302_s25 = sshll.u32 %s1441_s4, 4  ;;  %s1188_s24 = smov 128   ;;  %s303_s25 = int_to_ptr.hbm [resolvable:$true] %s302_s25 }
  0x19   : > { %845 = dma.hbm_to_vmem [thread:$0]  (!%p1292_p5), %s292_s21, 128, %s294_s13, [#allocation10]  }
  0x1a   : > { %s319_s23 = sshll.u32 %s1442_s6, 4  ;;  %s1189_s15 = smov 8   ;;  %s320_s23 = int_to_ptr.hbm [resolvable:$true] %s319_s23 }
  0x1b   : > { %848 = dma.hbm_to_vmem [thread:$0]  (!%p1292_p5), %s303_s25, 1024, %s305_s17, [#allocation10], %s1188_s24, %s1188_s24, %s1189_s15  }
  0x1c   : > { %s1190_s18 = smov [#allocation12]   ;;  %s35_s26 = sadd.s32 1, %s1179_s9 }
  0x1d   : > { %s321_s21 = sshll.u32 %s1190_s18, 4  ;;  %s47_s13 = sadd.s32 1, %s1171_s29  ;;  %s322_s21 = int_to_ptr.vmem [resolvable:$true] %s321_s21 }
  0x1e   : > { %851 = dma.hbm_to_vmem [thread:$0]  (!%p1292_p5), %s320_s23, 256, %s322_s21, [#allocation13], %s1188_s24, %s1188_s24, %s1189_s15  }
  0x1f   : > { %p36_p6 = scmp.ge.s32.totalorder %s35_s26, 6  ;;  %p54_p7 = scmp.ne.s32.totalorder %s1171_s29, %s1167_s28 }
  0x20   : > { %p55_p8 = scmp.eq.s32.totalorder %s1183_s10, 0  ;;  %p60_p9 = scmp.ne.s32.totalorder %s1167_s28, %s1163_s27 }
  0x21   : > { %s1454_s26 = smov (%p36_p6, %s35_s26), 0  ;;  %p863_p12 = scmp.lt.s32.totalorder %s1183_s10, 6 }
  0x22   : > { %1443 = sst [smem:[#allocation20_spill]] %s1454_s26  ;;  %p1319_p10 = por %p55_p8, %p54_p7 }
  0x23   : > { %p1325_p11 = por %p1273_p1, %p60_p9  ;;  %s42_s14 = ssub.s32 %s1179_s9, %s1454_s26 }
  0x24   : > { %p45_p13 = scmp.eq.s32.totalorder %s42_s14, 0  ;;  %s338_s17 = sand.u32 1, %s1171_s29  }
  0x25   : > { %s797_s19 = sshll.u32 %s338_s17, 3  ;;  %s798_s20 = sshll.u32 %s1179_s9, 3 }
  0x26   : > { %s1334_s27 = scalar_select %p45_p13, %s1171_s29, %s47_s13  }
  0x27   : > { %s347_s15 = scalar_lea.hbm %s1419_s0, %s798_s20  ;;  %s342_s18 = scalar_lea.vmem [#allocation4], %s797_s19 }
  0x28   : > { %s351_s21 = sshll.u32 %s342_s18, 4  ;;  %s349_s11 = sshll.u32 %s347_s15, 4  ;;  %s352_s21 = int_to_ptr.vmem [resolvable:$true] %s351_s21  ;;  %s350_s11 = int_to_ptr.hbm [resolvable:$true] %s349_s11 }
  0x29   : > { %p853_p0 = pnand %p863_p12, %p1319_p10  ;;  %s367_s14 = scalar_lea.hbm %s1420_s1, %s798_s20 }
  0x2a   : > { %s358_s4 = sand.u32 1, %s1183_s10   ;;  %s339_s6 = scalar_lea.sflag [#allocation5], %s338_s17 }
  0x2b   : > { %855 = dma.hbm_to_vmem [thread:$0]  (!%p853_p0), %s350_s11, 128, %s352_s21, %s339_s6  }
  0x2c   : > { %s369_s13 = sshll.u32 %s367_s14, 4  ;;  %s362_s26 = scalar_lea.vmem [#allocation6], %s797_s19  ;;  %s370_s13 = int_to_ptr.hbm [resolvable:$true] %s369_s13 }
  0x2d   : > { %s371_s9 = sshll.u32 %s362_s26, 4  ;;  %s359_s23 = scalar_lea.sflag [#allocation7], %s358_s4  ;;  %s372_s9 = int_to_ptr.vmem [resolvable:$true] %s371_s9 }
  0x2e   : > { %858 = dma.hbm_to_vmem [thread:$0]  (!%p853_p0), %s370_s13, 128, %s372_s9, %s359_s23  }
  0x2f   : > { %380 = sbr.rel (%p1281_p3) target bundleno = 677 (0x2a5), region = 52  ;;  %s382_s25 = sand.u32 (!%p1281_p3), 1, %s1167_s28  }
  0x30   : > { %s1349_s24 = sshll.u32 (!%p1281_p3), %s382_s25, 3  ;;  %s383_s2 = scalar_lea.sflag (!%p1281_p3), [#allocation5], %s382_s25 }
  0x31   : > { %s386_s3 = scalar_lea.vmem (!%p1281_p3), [#allocation4], %s1349_s24 }
  0x34   : > { %1142 = dma.done.wait (%p1325_p11), %s383_s2, 128  }
  0x35   : > { %1144 = vsyncadd (%p1325_p11), %s383_s2, 4294967168  ;;  %s1446_s6 = sadd.s32 4294967295, %s1183_s10   ;;  %s396_s11 = scalar_lea.vmem [#allocation6], %s1349_s24 }
  0x36   : > { %s392_s4 = sand.u32 1, %s1446_s6  }
  0x37   : > { %s393_s9 = scalar_lea.sflag [#allocation7], %s392_s4 }
  0x38   : > { %1146 = dma.done.wait (%p1325_p11), %s393_s9, 128  }
  0x39   : > { %1148 = vsyncadd (%p1325_p11), %s393_s9, 4294967168 }
  0x3a   : > { %1150 = dma.done.wait (%p1273_p1), [#allocation7], 128  }
  0x3b   : > { %1152 = vsyncadd (%p1273_p1), [#allocation7], 4294967168 }
  0x3c   : > { %1154 = dma.done.wait (%p1273_p1), [#allocation10], 1152  }
  0x3d   : > { %1156 = vsyncadd (%p1273_p1), [#allocation10], 4294966144 }
  0x3e   : > { %1158 = dma.done.wait (%p1273_p1), [#allocation13], 256  }
  0x3f   : > { %1160 = vsyncadd (%p1273_p1), [#allocation13], 4294967040  ;;  %p458_p2 = scmp.lt.s32.totalorder %s1175_s30, 5  ;;  %p810_p3 = scmp.ne.s32.totalorder %s1175_s30, 0 }
  0x41   : > { %s459_s16 = scalar_select %p458_p2, %s1175_s30, 5 }
  0x42   : > { %469 = sbr.rel (%p810_p3) target bundleno = 74 (0x4a), region = 80 }
  0x43   : > { %s818_s26 = sshll.u32 %s459_s16, 4 }
  0x44   : > { %s1380_s19 = scalar_lea.vmem %s1427_s8, %s818_s26 }
  0x47   : > { %v470_v0 = vld [vmem:[#allocation8] sm:$0xff]  ;;  %vm471_vm0 = vcmask 261120   ;;  %v473_v1 = vld [vmem:[#allocation9] sm:$0xff] }
  0x48   : > { %472 = vst.msk [vmem:[#allocation2] sm:$0xff] %vm471_vm0, %v470_v0 }
  0x49   : > { %474 = vst.msk [vmem:[#allocation3] sm:$0xff] %vm471_vm0, %v473_v1 }
  0x4a PF: > { %v484_v2 = vld [vmem:[#allocation11 + $0x38] sm:$0xff]  ;;  %v483_v4 = vld [vmem:[#allocation11 + $0x30] sm:$0xff]  ;;  %v482_v6 = vld [vmem:[#allocation11 + $0x28] sm:$0xff]  ;;  %vm485_vm1 = vcmask 261120   ;;  %vm568_vm2 = vcmask 130048   ;;  %v537_v24 = vlaneseq  ;;  %s1191_s20 = smov 32  }
  0x4b   : > { %v480_v3 = vld [vmem:[#allocation11 + $0x18] sm:$0xff]  ;;  %501 = vmatpush.msra.mxu0 %v484_v2  ;;  %v479_v5 = vld [vmem:[#allocation11 + $0x10] sm:$0xff]  ;;  %v478_v7 = vld [vmem:[#allocation11 + $0x8] sm:$0xff]  ;;  %s1192_s21 = smov 96   ;;  %s1193_s14 = smov 64  }
  0x4c   : > { %524 = vmatpush.msra.mxu1 %v480_v3  ;;  %v481_v8 = vld [vmem:[#allocation11 + $0x20] sm:$0xff]  ;;  %v475_v11 = vld [vmem:[%s386_s3] sm:$0xff]  ;;  %v563_v12 = vld [vmem:[#allocation12 + $0x8] sm:$0xff]  ;;  %v538_v27 = vand.u32 127, %v537_v24 }
  0x4d   : > { %502 = vmatpush.msra.mxu0 %v483_v4  ;;  %v477_v9 = vld [vmem:[#allocation11] sm:$0xff]  ;;  %586 = vmatpush.msra.mxu2 %v563_v12 }
  0x4e   : > { %525 = vmatpush.msra.mxu1 %v479_v5  ;;  %v562_v13 = vld [vmem:[#allocation12] sm:$0xff]  ;;  %vm539_vm5 = vcmp.lt.s32.totalorder %v538_v27, 96 }
  0x4f   : > { %503 = vmatpush.msra.mxu0 %v482_v6  ;;  %v476_v10 = vld [vmem:[#allocation2] sm:$0xff]  ;;  %587 = vmatpush.msra.mxu2 %v562_v13 }
  0x50   : > { %526 = vmatpush.msra.mxu1 %v478_v7  ;;  %v561_v14 = vld [vmem:[%s396_s11] sm:$0xff] }
  0x51   : > { %504 = vmatpush.msra.mxu0 %v481_v8  ;;  %814 = vmatmul.msk.f32.vlgmr.msra.gmra.mxu2 %vm568_vm2, %v561_v14  ;;  %v925_v15 = vld [vmem:[%s1424_s5] ss:$0 sm:$0xff]  ;;  %v593_v37 = vld [vmem:[#allocation3] sm:$0xff] }
  0x52   : > { %527 = vmatpush.msra.mxu1 %v477_v9  ;;  %811 = vmatmul.msk.f32.vlgmr.msra.gmra.mxu0 %vm485_vm1, %v476_v10  ;;  %v926_v38 = vld [vmem:[%s1426_s7] ss:$0 sm:$0xff] }
  0x53   : > { %812 = vmatmul.msk.f32.vlgmr.msra.gmra.mxu1 %vm485_vm1, %v475_v11 }
  0xcf   : > { %v506_v16 = vpop.f32.mrf.mxu0 }
  0xd0   : > { %v529_v17 = vpop.f32.mrf.mxu1 }
  0xd1   : > { %v530_v18 = vadd.f32 %v529_v17, %v506_v16 }
  0xd3   : > { %v536_v19 = vadd.f32 %v925_v15, %v530_v18 }
  0xd4   : > { %v589_v39 = vpop.f32.mrf.mxu2 }
  0xd5   : > { %v813_v20 = vmul.f32 -1.442695, %v536_v19  ;;  %v590_v40 = vadd.f32 %v926_v38, %v589_v39 }
  0xd7   : > { %927 = vpow2.f32 %v813_v20 }
  0xdd   : > { %v928_v21 = vpop.eup %927 }
  0xde   : > { %v543_v22 = vadd.f32 1.0, %v928_v21 }
  0xe0   : > { %929 = vrcp.f32 %v543_v22  ;;  %v555_v28 = vand.u32 2147483648, %v543_v22  ;;  %v553_v30 = vand.u32 2147483647, %v543_v22  ;;  %vm549_vm4 = vweird.f32 %v543_v22 }
  0xe1   : > { %931 = vtanh.f32 %v536_v19 }
  0xe2   : > { %v556_v32 = vor.u32 1.1754944e-38, %v555_v28  ;;  %vm554_vm7 = vcmp.eq.f32.partialorder %v553_v30, 8.507059e+37  ;;  %933 = vtanh.f32 %v590_v40 }
  0xe6   : > { %v930_v23 = vpop.eup %929 }
  0xe7   : > { %v545_v25 = vmul.f32 %v930_v23, %v543_v22  ;;  %vm550_vm3 = vweird.f32 %v930_v23  ;;  %v932_v34 = vpop.eup %931 }
  0xe8   : > { %vm551_vm6 = vmor %vm549_vm4, %vm550_vm3  ;;  %v934_v43 = vpop.eup %933 }
  0xe9   : > { %v546_v26 = vsub.f32 1.0, %v545_v25 }
  0xeb   : > { %v547_v29 = vmul.f32 %v930_v23, %v546_v26 }
  0xed   : > { %v548_v31 = vadd.f32 %v930_v23, %v547_v29 }
  0xef   : > { %v552_v33 = vsel %vm551_vm6, %v930_v23, %v548_v31 }
  0xf0   : > { %v557_v35 = vsel %vm554_vm7, %v556_v32, %v552_v33 }
  0xf1   : > { %v560_v36 = vsel %vm539_vm5, %v557_v35, %v932_v34 }
  0xf2   : > { %600 = vrot.lane.b32.xlu0 %v560_v36, %s1191_s20 }
  0xfa   : > { %595 = vrot.lane.b32.xlu0 %v593_v37, %s1191_s20 }
 0x164   : > { %v601_v41 = vpop.permute.xlu0 %600 }
 0x165   : > { %v603_v42 = vmul.f32 %v601_v41, %v560_v36 }
 0x167   : > { %605 = vrot.lane.b32.xlu1 %v603_v42, %s1191_s20 }
 0x16c   : > { %v596_v45 = vpop.permute.xlu0 %595 }
 0x16d   : > { %v598_v46 = vmul.f32 %v596_v45, %v560_v36 }
 0x16f   : > { %610 = vrot.lane.b32.xlu1 %v934_v43, %s1191_s20 }
 0x1d9   : > { %v606_v44 = vpop.permute.xlu1 %605 }
 0x1da   : > { %v608_v47 = vadd.f32 %v606_v44, %v598_v46 }
 0x1e1   : > { %v611_v48 = vpop.permute.xlu1 %610 }
 0x1e2   : > { %v613_v49 = vadd.f32 %v611_v48, %v608_v47 }
 0x1e4   : > { %935 = vtanh.f32 %v613_v49  ;;  %626 = vrot.lane.b32.xlu0 %v613_v49, %s1192_s21 }
 0x1ea   : > { %v936_v50 = vpop.eup %935 }
 0x1eb   : > { %616 = vrot.lane.b32.xlu2 %v936_v50, %s1191_s20 }
 0x245   : > { %v617_v51 = vpop.permute.xlu2 %616 }
 0x246   : > { %v619_v52 = vmul.f32 %v617_v51, %v560_v36 }
 0x248   : > { %621 = vrot.lane.b32.xlu2 %v619_v52, %s1193_s14 }
 0x256   : > { %v627_v53 = vpop.permute.xlu0 %626 }
 0x257   : > { %629 = vst.msk [vmem:[#allocation3] sm:$0xff] %vm485_vm1, %v627_v53 }
 0x258   : > { %815 = vst.msk [vmem:[%s1380_s19 + $0x8] sm:$0xff] %vm485_vm1, %v627_v53 }
 0x2a2   : > { %v622_v54 = vpop.permute.xlu2 %621 }
 0x2a3   : > { %624 = vst.msk [vmem:[#allocation2] sm:$0xff] %vm485_vm1, %v622_v54 }
 0x2a4   : > { %630 = vst.msk [vmem:[%s1380_s19] sm:$0xff] %vm485_vm1, %v622_v54 }
 0x2a5 PF: > { %s26_s10 = sadd.s32 1, %s1183_s10   ;;  %s1447_s13 = smov %s1334_s27 }
 0x2a6   : > { %p23_p1 = scmp.ge.s32.totalorder %s26_s10, 8   ;;  %s1448_s30 = sld [smem:[#allocation19_spill]] }
 0x2a7   : > { %s1449_s9 = sld [smem:[#allocation20_spill]]  ;;  %s1450_s27 = smov %s1167_s28 }
 0x2a8   : > { %s1451_s28 = smov %s1171_s29  ;;  %s1452_s29 = smov %s1447_s13 }
 0x2a9   :  { %25 = sbr.rel (!%p23_p1) target bundleno = 13 (0xd), region = 128 }
 0x2ae   :  { %660 = vsyncpa [#allocation5], 1 }
 0x2af   :  { %662 = vsyncpa [#allocation5 + $0x1], 1 }
 0x2b0   :  { %663 = vsyncpa [#allocation7], 1 }
 0x2b1   :  { %665 = vsyncpa [#allocation7 + $0x1], 1 }
 0x2b2   :  { %666 = vsyncpa [#allocation10], 1 }
 0x2b3   :  { %667 = vsyncpa [#allocation13], 1 }

</bundles_post_ra>
